<compile_context>
chip_gen: v5e
topology: v5e:2x2
jax: 0.10.0
libtpu: 0.0.40
codegen_flags: <defaults>
</compile_context>

<pallas_src>
import functools

import jax
import jax.numpy as jnp
from jax.experimental import pallas as pl
from jax.experimental.pallas import tpu as pltpu

P_DROP = 0.4
IN_DIM = 100
HID_DIM = 20
OUT_DIM = 2

PAD = 128          # lane-dense width for the hidden / output slab
OUT_COL = 64       # column where the 2 "out" logits land inside the slab

# Packed-parameter row layout (all offsets 8-aligned for clean sublane tiles).
R_W1 = 0                 # rows [0, 100): W1  (100 x 20) in cols 0:20
R_B1 = 104               # row  104     : b1  (20,)      in cols 0:20
R_W2 = 112               # rows [112, 240): W2 (20 x 2)  in rows 0:20, cols 64:66
R_B2 = 240               # row  240     : b2  (2,)       in cols 64:66
TOTAL_ROWS = 248

# keep element  <=>  uniform u32 >= round(p * 2^32)   (P(keep) = 1 - p = 0.6)
_DROP_THRESH = int(round(P_DROP * (1 << 32)))


def _round_up(x, m):
    return ((x + m - 1) // m) * m


def _ff3_kernel(*refs, training: bool, use_bf16: bool):
    if training:
        bits_ref, x_ref, p_ref, o_ref = refs
    else:
        x_ref, p_ref, o_ref = refs
        bits_ref = None

    x = x_ref[...]                                   # (tile_b, 100) f32

    if training:
        # Inverted dropout, p=0.4: single unsigned-int threshold compare on the
        # raw random bits (no float-uniform conversion needed).
        keep = bits_ref[...] >= jnp.uint32(_DROP_THRESH)
        x = jnp.where(keep, x * jnp.float32(1.0 / (1.0 - P_DROP)), 0.0)

    # Static slices of the packed, VMEM-resident parameter block.
    w1 = p_ref[R_W1:R_W1 + IN_DIM, :]                # (100, 128)
    b1 = p_ref[R_B1:R_B1 + 1, :]                     # (1, 128)
    w2 = p_ref[R_W2:R_W2 + PAD, :]                   # (128, 128)
    b2 = p_ref[R_B2:R_B2 + 1, :]                     # (1, 128)

    if use_bf16:
        lin = jnp.dot(x.astype(jnp.bfloat16), w1.astype(jnp.bfloat16),
                      preferred_element_type=jnp.float32) + b1
    else:
        lin = jnp.dot(x, w1, preferred_element_type=jnp.float32) + b1

    h = jnp.maximum(lin, 0.0)                        # ReLU (padded cols stay 0)

    if use_bf16:
        out = jnp.dot(h.astype(jnp.bfloat16), w2.astype(jnp.bfloat16),
                      preferred_element_type=jnp.float32) + b2
    else:
        out = jnp.dot(h, w2, preferred_element_type=jnp.float32) + b2

    # lin has zeros in cols 20:128; out has zeros outside cols 64:66, so the
    # sum packs both results into one lane-dense (tile_b, 128) store.
    o_ref[...] = lin + out


def _pack_params(w1, b1, w2, b2):
    """Pack (w1 (100,20), b1 (20,), w2 (20,2), b2 (2,)) into one (248,128) f32."""
    p = jnp.zeros((TOTAL_ROWS, PAD), jnp.float32)
    p = p.at[R_W1:R_W1 + IN_DIM, :HID_DIM].set(jnp.asarray(w1, jnp.float32))
    p = p.at[R_B1, :HID_DIM].set(jnp.asarray(b1, jnp.float32))
    p = p.at[R_W2:R_W2 + HID_DIM, OUT_COL:OUT_COL + OUT_DIM].set(
        jnp.asarray(w2, jnp.float32))
    p = p.at[R_B2, OUT_COL:OUT_COL + OUT_DIM].set(jnp.asarray(b2, jnp.float32))
    return p


def feedforward3_pallas(x, w1, b1, w2, b2, *, key=None, training=True,
                        tile_b=None, use_bf16=False):
    """x: (B, 100) f32. Returns (out (B,2), lin_out (B,20)) like the torch module.

    Dropout matches nn.Dropout(p=0.4) semantics (inverted dropout); the exact
    torch RNG stream cannot be reproduced bit-for-bit.
    """
    B = x.shape[0]
    x = jnp.asarray(x, jnp.float32)

    if tile_b is None:
        tile_b = min(512, _round_up(max(B, 1), 8))
    Bp = _round_up(B, tile_b)
    if Bp != B:
        x = jnp.pad(x, ((0, Bp - B), (0, 0)))
    grid = (Bp // tile_b,)

    params = _pack_params(w1, b1, w2, b2)

    x_spec = pl.BlockSpec((tile_b, IN_DIM), lambda i: (i, 0))
    p_spec = pl.BlockSpec((TOTAL_ROWS, PAD), lambda i: (0, 0))   # VMEM-resident
    o_spec = pl.BlockSpec((tile_b, PAD), lambda i: (i, 0))

    kernel = functools.partial(_ff3_kernel, training=training, use_bf16=use_bf16)

    if training:
        if key is None:
            key = jax.random.PRNGKey(0)
        # Random bits for the dropout mask, generated outside the kernel
        # (pltpu.prng_* has no interpret-mode lowering).
        bits = jax.random.bits(key, (Bp, IN_DIM), dtype=jnp.uint32)
        in_specs = [pl.BlockSpec((tile_b, IN_DIM), lambda i: (i, 0)),
                    x_spec, p_spec]
        args = (bits, x, params)
    else:
        in_specs = [x_spec, p_spec]
        args = (x, params)

    slab = pl.pallas_call(
        kernel,
        out_shape=jax.ShapeDtypeStruct((Bp, PAD), jnp.float32),
        grid=grid,
        in_specs=in_specs,
        out_specs=o_spec,
        compiler_params=pltpu.CompilerParams(
            dimension_semantics=("parallel",)),
    )(*args)

    lin_out = slab[:B, :HID_DIM]
    out = slab[:B, OUT_COL:OUT_COL + OUT_DIM]
    return out, lin_out


def _init_params(key):
    """Deterministic params mimicking torch nn.Linear default init
    (uniform(-1/sqrt(fan_in), 1/sqrt(fan_in))); stored already transposed."""
    k1, k2, k3, k4 = jax.random.split(key, 4)
    bound1 = 1.0 / jnp.sqrt(jnp.float32(IN_DIM))
    bound2 = 1.0 / jnp.sqrt(jnp.float32(HID_DIM))
    w1 = jax.random.uniform(k1, (IN_DIM, HID_DIM), jnp.float32, -bound1, bound1)
    b1 = jax.random.uniform(k2, (HID_DIM,), jnp.float32, -bound1, bound1)
    w2 = jax.random.uniform(k3, (HID_DIM, OUT_DIM), jnp.float32, -bound2, bound2)
    b2 = jax.random.uniform(k4, (OUT_DIM,), jnp.float32, -bound2, bound2)
    return w1, b1, w2, b2


if __name__ == "__main__":
    key = jax.random.PRNGKey(0)
    kx, kp, kd = jax.random.split(key, 3)

    B = 8
    x = jax.random.normal(kx, (B, IN_DIM), jnp.float32)
    w1, b1, w2, b2 = _init_params(kp)

    # Train-mode forward (dropout active) — matches nn.Module default mode.
    out_tr, lin_tr = feedforward3_pallas(x, w1, b1, w2, b2, key=kd, training=True)
    jax.block_until_ready((out_tr, lin_tr))
    assert out_tr.shape == (B, OUT_DIM) and lin_tr.shape == (B, HID_DIM)
    # Internal consistency: out must equal relu(lin) @ W2 + b2 for the SAME
    # dropout draw the kernel used.
    out_from_lin = jnp.maximum(lin_tr, 0.0) @ w2 + b2
    assert jnp.allclose(out_tr, out_from_lin, atol=1e-4, rtol=1e-4)

    # Eval-mode forward (dropout = identity) — verify against pure-JAX reference.
    out_ev, lin_ev = feedforward3_pallas(x, w1, b1, w2, b2, training=False)
    jax.block_until_ready((out_ev, lin_ev))
    lin_ref = x @ w1 + b1
    out_ref = jnp.maximum(lin_ref, 0.0) @ w2 + b2
    assert jnp.allclose(lin_ev, lin_ref, atol=1e-5, rtol=1e-5)
    assert jnp.allclose(out_ev, out_ref, atol=1e-5, rtol=1e-5)

    print("KERNEL_OK")
</pallas_src>

<mosaic_0001>
module attributes {stable_mosaic.version = 11 : i64} {
  func.func @_ff3_kernel(%arg0: i32, %arg1: memref<8x100xi32, #tpu.memory_space<vmem>>, %arg2: memref<8x100xf32, #tpu.memory_space<vmem>>, %arg3: memref<248x128xf32, #tpu.memory_space<vmem>>, %arg4: memref<8x128xf32, #tpu.memory_space<vmem>>) attributes {dimension_semantics = [#tpu.dimension_semantics<parallel>], iteration_bounds = array<i64: 1>, scalar_prefetch = 0 : i64, scratch_operands = 0 : i64, tpu.core_type = #tpu.core_type<tc>, window_params = [{transform_indices = @transform_0, window_bounds = array<i64: 8, 100>}, {transform_indices = @transform_1, window_bounds = array<i64: 8, 100>}, {pipeline_mode = #tpu.pipeline_mode<synchronous>, transform_indices = @transform_2, window_bounds = array<i64: 248, 128>}, {transform_indices = @transform_3, window_bounds = array<i64: 8, 128>}]} {
    %c0 = arith.constant 0 : index
    %c0_0 = arith.constant 0 : index
    %0 = vector.load %arg2[%c0, %c0_0] : memref<8x100xf32, #tpu.memory_space<vmem>>, vector<8x100xf32>
    %c0_1 = arith.constant 0 : index
    %c0_2 = arith.constant 0 : index
    %1 = vector.load %arg1[%c0_1, %c0_2] : memref<8x100xi32, #tpu.memory_space<vmem>>, vector<8x100xi32>
    %c1717986918_i32 = arith.constant 1717986918 : i32
    %2 = vector.broadcast %c1717986918_i32 : i32 to vector<8x100xi32>
    %3 = arith.cmpi uge, %1, %2 : vector<8x100xi32>
    %cst = arith.constant 1.66666663 : f32
    %4 = vector.broadcast %cst : f32 to vector<8x100xf32>
    %5 = arith.mulf %0, %4 : vector<8x100xf32>
    %cst_3 = arith.constant 0.000000e+00 : f32
    %6 = vector.broadcast %cst_3 : f32 to vector<8x100xf32>
    %7 = arith.select %3, %5, %6 : vector<8x100xi1>, vector<8x100xf32>
    %c0_4 = arith.constant 0 : index
    %c0_5 = arith.constant 0 : index
    %8 = vector.load %arg3[%c0_4, %c0_5] : memref<248x128xf32, #tpu.memory_space<vmem>>, vector<100x128xf32>
    %c104 = arith.constant 104 : index
    %c0_6 = arith.constant 0 : index
    %9 = vector.load %arg3[%c104, %c0_6] : memref<248x128xf32, #tpu.memory_space<vmem>>, vector<1x128xf32>
    %c112 = arith.constant 112 : index
    %c0_7 = arith.constant 0 : index
    %10 = vector.load %arg3[%c112, %c0_7] : memref<248x128xf32, #tpu.memory_space<vmem>>, vector<128x128xf32>
    %c240 = arith.constant 240 : index
    %c0_8 = arith.constant 0 : index
    %11 = vector.load %arg3[%c240, %c0_8] : memref<248x128xf32, #tpu.memory_space<vmem>>, vector<1x128xf32>
    %cst_9 = arith.constant dense<0.000000e+00> : vector<8x128xf32>
    %12 = tpu.matmul %7, %8, %cst_9 {dimension_numbers = #tpu.dot_dimension_numbers<[1], [0], [0], [1], [0, 0, 1, 1], [], []>} : vector<8x100xf32>, vector<100x128xf32>, vector<8x128xf32> -> vector<8x128xf32>
    %13 = vector.broadcast %9 : vector<1x128xf32> to vector<8x128xf32>
    %14 = arith.addf %12, %13 : vector<8x128xf32>
    %cst_10 = arith.constant 0.000000e+00 : f32
    %15 = vector.broadcast %cst_10 : f32 to vector<8x128xf32>
    %16 = arith.maximumf %14, %15 : vector<8x128xf32>
    %cst_11 = arith.constant dense<0.000000e+00> : vector<8x128xf32>
    %17 = tpu.matmul %16, %10, %cst_11 {dimension_numbers = #tpu.dot_dimension_numbers<[1], [0], [0], [1], [0, 0, 1, 1], [], []>} : vector<8x128xf32>, vector<128x128xf32>, vector<8x128xf32> -> vector<8x128xf32>
    %18 = vector.broadcast %11 : vector<1x128xf32> to vector<8x128xf32>
    %19 = arith.addf %17, %18 : vector<8x128xf32>
    %20 = arith.addf %14, %19 : vector<8x128xf32>
    %c0_12 = arith.constant 0 : index
    %c0_13 = arith.constant 0 : index
    %21 = vector.load %arg4[%c0_12, %c0_13] : memref<8x128xf32, #tpu.memory_space<vmem>>, vector<8x128xf32>
    tpu.vector_store %arg4[%c0_12, %c0_13], %20 {strides = array<i32>} : memref<8x128xf32, #tpu.memory_space<vmem>>, vector<8x128xf32>,
    return
  }
  func.func @transform_0(%arg0: i32) -> (i32, i32) {
    %c0_i32 = arith.constant 0 : i32
    %c0_i32_0 = arith.constant 0 : i32
    return %arg0, %c0_i32 : i32, i32
  }
  func.func @transform_1(%arg0: i32) -> (i32, i32) {
    %c0_i32 = arith.constant 0 : i32
    %c0_i32_0 = arith.constant 0 : i32
    return %arg0, %c0_i32 : i32, i32
  }
  func.func @transform_2(%arg0: i32) -> (i32, i32) {
    %c0_i32 = arith.constant 0 : i32
    %c0_i32_0 = arith.constant 0 : i32
    %c0_i32_1 = arith.constant 0 : i32
    return %c0_i32, %c0_i32_0 : i32, i32
  }
  func.func @transform_3(%arg0: i32) -> (i32, i32) {
    %c0_i32 = arith.constant 0 : i32
    %c0_i32_0 = arith.constant 0 : i32
    return %arg0, %c0_i32 : i32, i32
  }
}

</mosaic_0001>

<bundles_post_ra>
// kernel: tpu_custom_call.1
= control target key start
LH: loop header
LB: loop body
LE: loop exit
PB: predicated region body
PF: predicated region fallthrough
CT: control target
= control target key end

     0   :  { %8 = vsyncpa [#allocation3], 0  ;;  %s318_s0 = inlined_call_operand.hbm [shape: u32[8,100], index: 0, kind: input, shape index: {}]   ;;  %s319_s1 = inlined_call_operand.hbm [shape: f32[8,100], index: 1, kind: input, shape index: {}]   ;;  %s320_s2 = inlined_call_operand.hbm [shape: f32[248,128], index: 2, kind: input, shape index: {}]   ;;  %s321_s3 = inlined_call_operand.hbm [shape: f32[8,128], index: 3, kind: output, shape index: {}]  }
   0x1   :  { %9 = vsyncpa [#allocation6], 0  ;;  %s27_s14 = sshll.u32 %s319_s1, 4  ;;  %s28_s14 = int_to_ptr.hbm [resolvable:$true] %s27_s14 }
   0x2   :  { %10 = vsyncpa [#allocation4], 0  ;;  %s280_s15 = smov [#allocation5]   ;;  %s16_s19 = sshll.u32 %s318_s0, 4  ;;  %s17_s19 = int_to_ptr.hbm [resolvable:$true] %s16_s19 }
   0x3   :  { %s29_s16 = sshll.u32 %s280_s15, 4  ;;  %s281_s20 = smov [#allocation2]   ;;  %s30_s16 = int_to_ptr.vmem [resolvable:$true] %s29_s16 }
   0x4   :  { %32 = dma.hbm_to_vmem [thread:$0]  %s28_s14, 128, %s30_s16, [#allocation6]  }
   0x5   :  { %s18_s21 = sshll.u32 %s281_s20, 4  ;;  %s37_s24 = sshll.u32 %s320_s2, 4  ;;  %s19_s21 = int_to_ptr.vmem [resolvable:$true] %s18_s21  ;;  %s38_s24 = int_to_ptr.hbm [resolvable:$true] %s37_s24 }
   0x6   :  { %21 = dma.hbm_to_vmem [thread:$0]  %s17_s19, 128, %s19_s21, [#allocation3]  }
   0x7   :  { %s282_s1 = smov [#allocation7]   ;;  %s283_s26 = smov 128  }
   0x8   :  { %s39_s25 = sshll.u32 %s282_s1, 4  ;;  %s284_s27 = smov 8   ;;  %s40_s25 = int_to_ptr.vmem [resolvable:$true] %s39_s25 }
   0x9   :  { %45 = dma.hbm_to_vmem [thread:$0]  %s38_s24, 3968, %s40_s25, [#allocation6], %s283_s26, %s283_s26, %s284_s27  }
   0xa   :  { %274 = dma.done.wait [#allocation3], 128  }
   0xb   :  { %275 = vsyncadd [#allocation3], 4294967168 }
   0xc   :  { %276 = dma.done.wait [#allocation6], 4096  }
   0xd   :  { %277 = vsyncadd [#allocation6], 4294963200  ;;  %vm101_vm0 = vcmask 1043456   ;;  %v77_v0 = vld [vmem:[#allocation7 + $0x60] sm:$0xf]  ;;  %v76_v1 = vld [vmem:[#allocation7 + $0x58] sm:$0xff] }
   0xe   :  { %168 = vmatpush.msk.msra.mxu0 %vm101_vm0, %v77_v0  ;;  %v75_v2 = vld [vmem:[#allocation7 + $0x50] sm:$0xff]  ;;  %v74_v3 = vld [vmem:[#allocation7 + $0x48] sm:$0xff]  ;;  %v93_v5 = vld [vmem:[#allocation7 + $0xe0] sm:$0xff]  ;;  %vm97_vm2 = vcmask 818176   ;;  %s285_s0 = smov [#allocation8]   ;;  %s156_s30 = sshll.u32 %s321_s3, 4  ;;  %s157_s30 = int_to_ptr.hbm [resolvable:$true] %s156_s30 }
   0xf   :  { %v94_v4 = vld [vmem:[#allocation7 + $0xe8] sm:$0xff]  ;;  %v73_v6 = vld [vmem:[#allocation7 + $0x40] sm:$0xff]  ;;  %v92_v7 = vld [vmem:[#allocation7 + $0xd8] sm:$0xff]  ;;  %s154_s2 = sshll.u32 %s285_s0, 4  ;;  %s155_s2 = int_to_ptr.vmem [resolvable:$true] %s154_s2 }
  0x10   :  { %109 = vmatpush.msra.mxu0 %v76_v1  ;;  %127 = vmatpush.msra.mxu1 %v94_v4  ;;  %v72_v8 = vld [vmem:[#allocation7 + $0x38] sm:$0xff]  ;;  %v91_v9 = vld [vmem:[#allocation7 + $0xd0] sm:$0xff]  ;;  %v90_v11 = vld [vmem:[#allocation7 + $0xc8] sm:$0xff] }
  0x11   :  { %v71_v10 = vld [vmem:[#allocation7 + $0x30] sm:$0xff]  ;;  %v70_v12 = vld [vmem:[#allocation7 + $0x28] sm:$0xff]  ;;  %v89_v14 = vld [vmem:[#allocation7 + $0xc0] sm:$0xff] }
  0x12   :  { %110 = vmatpush.msra.mxu0 %v75_v2  ;;  %128 = vmatpush.msra.mxu1 %v93_v5  ;;  %v59_v13 = vld [vmem:[#allocation2] sm:$0xff]  ;;  %v69_v15 = vld [vmem:[#allocation7 + $0x20] sm:$0xff]  ;;  %v88_v16 = vld [vmem:[#allocation7 + $0xb8] sm:$0xff] }
  0x13   :  { %v68_v17 = vld [vmem:[#allocation7 + $0x18] sm:$0xff]  ;;  %v167_v19 = vxor.u32 2147483648, %v59_v13  ;;  %v87_v20 = vld [vmem:[#allocation7 + $0xb0] sm:$0xff]  ;;  %v86_v23 = vld [vmem:[#allocation7 + $0xa8] sm:$0xff] }
  0x14   :  { %111 = vmatpush.msra.mxu0 %v74_v3  ;;  %129 = vmatpush.msra.mxu1 %v92_v7  ;;  %v58_v18 = vld [vmem:[#allocation5] sm:$0xff]  ;;  %v67_v21 = vld [vmem:[#allocation7 + $0x10] sm:$0xff]  ;;  %v66_v24 = vld [vmem:[#allocation7 + $0x8] sm:$0xff] }
  0x15   :  { %v63_v22 = vmul.f32 1.6666666, %v58_v18  ;;  %vm62_vm1 = vcmp.ge.s32.totalorder %v167_v19, 3865470566  ;;  %v85_v25 = vld [vmem:[#allocation7 + $0xa0] sm:$0xff]  ;;  %v84_v28 = vld [vmem:[#allocation7 + $0x98] sm:$0xff] }
  0x16   :  { %112 = vmatpush.msra.mxu0 %v73_v6  ;;  %130 = vmatpush.msra.mxu1 %v91_v9  ;;  %v65_v26 = vld [vmem:[#allocation7] sm:$0xff]  ;;  %v83_v29 = vld [vmem:[#allocation7 + $0x90] sm:$0xff]  ;;  %v82_v30 = vld [vmem:[#allocation7 + $0x88] sm:$0xff] }
  0x17   :  { %v64_v27 = vsel %vm62_vm1, %v63_v22, 0.0  ;;  %v81_v31 = vld [vmem:[#allocation7 + $0x80] sm:$0xff]  ;;  %v80_v32 = vld [vmem:[#allocation7 + $0x78] sm:$0xff]  ;;  %v79_v33 = vld [vmem:[#allocation7 + $0x70] sm:$0xff] }
  0x18   :  { %113 = vmatpush.msra.mxu0 %v72_v8  ;;  %131 = vmatpush.msra.mxu1 %v90_v11  ;;  %v176_v34 = vld [vmem:[#allocation7 + $0x68] ss:$0 sm:$0xff]  ;;  %v177_v38 = vld [vmem:[#allocation7 + $0xf0] ss:$0 sm:$0xff] }
  0x1a   :  { %114 = vmatpush.msra.mxu0 %v71_v10  ;;  %132 = vmatpush.msra.mxu1 %v89_v14 }
  0x1c   :  { %115 = vmatpush.msra.mxu0 %v70_v12  ;;  %133 = vmatpush.msra.mxu1 %v88_v16 }
  0x1e   :  { %116 = vmatpush.msra.mxu0 %v69_v15  ;;  %134 = vmatpush.msra.mxu1 %v87_v20 }
  0x20   :  { %117 = vmatpush.msra.mxu0 %v68_v17  ;;  %135 = vmatpush.msra.mxu1 %v86_v23 }
  0x22   :  { %118 = vmatpush.msra.mxu0 %v67_v21  ;;  %136 = vmatpush.msra.mxu1 %v85_v25 }
  0x24   :  { %119 = vmatpush.msra.mxu0 %v66_v24  ;;  %137 = vmatpush.msra.mxu1 %v84_v28 }
  0x26   :  { %120 = vmatpush.msra.mxu0 %v65_v26  ;;  %138 = vmatpush.msra.mxu1 %v83_v29 }
  0x27   :  { %169 = vmatmul.msk.f32.vlgmr.msra.gmra.mxu0 %vm97_vm2, %v64_v27 }
  0x28   :  { %139 = vmatpush.msra.mxu1 %v82_v30 }
  0x2a   :  { %140 = vmatpush.msra.mxu1 %v81_v31 }
  0x2c   :  { %141 = vmatpush.msra.mxu1 %v80_v32 }
  0x2e   :  { %142 = vmatpush.msra.mxu1 %v79_v33 }
  0xa4   :  { %v122_v35 = vpop.f32.mrf.mxu0 }
  0xa5   :  { %v123_v36 = vadd.f32 %v176_v34, %v122_v35 }
  0xa7   :  { %v125_v37 = vmax.f32 %v123_v36, 0.0 }
  0xa9   :  { %143 = vmatmul.f32.vlgmr.msra.gmra.mxu1 %v125_v37 }
 0x126   :  { %v144_v39 = vpop.f32.mrf.mxu1 }
 0x127   :  { %v145_v40 = vadd.f32 %v177_v38, %v144_v39 }
 0x129   :  { %v147_v41 = vadd.f32 %v145_v40, %v123_v36 }
 0x12b   :  { %148 = vst [vmem:[#allocation8] sm:$0xff] %v147_v41 }
 0x12c   :  { %159 = dma.vmem_to_hbm [thread:$0]  %s155_s2, 128, %s157_s30, [#allocation4]  }
 0x12d   :  { %278 = dma.done.wait [#allocation4], 128  }
 0x12e   :  { %279 = vsyncadd [#allocation4], 4294967168 }
 0x12f   :  { %164 = vsyncpa [#allocation3], 1 }
 0x130   :  { %165 = vsyncpa [#allocation6], 1 }
 0x131   :  { %166 = vsyncpa [#allocation4], 1 }

</bundles_post_ra>
